<compile_context>
chip_gen: v7x
topology: tpu7x:2x2x1
jax: 0.10.0
libtpu: 0.0.40
codegen_flags: <defaults>
</compile_context>

<pallas_src>
import functools

import jax
import jax.numpy as jnp
from jax.experimental import pallas as pl
from jax.experimental.pallas import tpu as pltpu

NUM_SAMPLES = 11        # CrossEntropyLoss 'mean' is over this axis per batch entry
NUM_CLASSES = 256

STRIP_ROWS = 64         # rows per inner step: (64, 256) f32 = 16 vregs
MAX_TILE_ROWS_F32 = 4096   # 4 MiB/tile logits, 8 MiB double-buffered
MAX_TILE_ROWS_16B = 8192   # bf16/fp16 tiles are half the bytes


def _round_up(x, m):
    return ((x + m - 1) // m) * m


def _ce_tile_kernel(logits_ref, labels_ref, out_ref, *, total_rows, strip_rows):
    """Partial sum of per-row cross-entropy over one (tile_rows, 256) block.

    logits_ref: (tile_rows, 256) input dtype
    labels_ref: (tile_rows // strip_rows, strip_rows) int32, lane-dense
    out_ref:    (1, 128) float32 partial sum (same value in every lane)
    """
    tile_rows = logits_ref.shape[0]
    n_strips = tile_rows // strip_rows
    tile_row0 = pl.program_id(0) * tile_rows

    def strip_body(s, acc):
        r = pl.multiple_of(s * strip_rows, strip_rows)
        x = logits_ref[pl.ds(r, strip_rows), :].astype(jnp.float32)     # (SR, 256)

        # --- label relayout: (1, SR) lane vector -> (SR, 1) sublane vector ---
        # identity-masked lane reduction (broadcast + iota compare + sum); avoids
        # an unsupported (1,N)->(N,1) reshape/transpose.
        lab_row = labels_ref[pl.ds(s, 1), :].astype(jnp.float32)        # (1, SR)
        lab_b = jnp.broadcast_to(lab_row, (strip_rows, strip_rows))     # (SR, SR)
        eye = (jax.lax.broadcasted_iota(jnp.int32, (strip_rows, strip_rows), 0) ==
               jax.lax.broadcasted_iota(jnp.int32, (strip_rows, strip_rows), 1))
        lab_col = jnp.sum(jnp.where(eye, lab_b, 0.0), axis=1,
                          keepdims=True).astype(jnp.int32)              # (SR, 1)

        # gather x[j, lab[j]] via a lane-iota one-hot select
        lane = jax.lax.broadcasted_iota(jnp.int32, (strip_rows, NUM_CLASSES), 1)
        picked = jnp.sum(jnp.where(lane == lab_col, x, 0.0), axis=-1,
                         keepdims=True)                                 # (SR, 1)

        # numerically-stable logsumexp over the class (lane) axis
        m = jnp.max(x, axis=-1, keepdims=True)                          # (SR, 1)
        lse = m + jnp.log(jnp.sum(jnp.exp(x - m), axis=-1, keepdims=True))

        # mask padded / ragged-block rows (global row index >= total_rows)
        rows = tile_row0 + r + jax.lax.broadcasted_iota(
            jnp.int32, (strip_rows, 1), 0)
        per_row = jnp.where(rows < total_rows, lse - picked, 0.0)       # (SR, 1)
        return acc + per_row

    acc = jax.lax.fori_loop(0, n_strips, strip_body,
                            jnp.zeros((strip_rows, 1), jnp.float32),
                            unroll=min(8, n_strips))

    # Single reduce-to-scalar per tile; lane-dense partial-sum write.
    out_ref[...] = jnp.full(out_ref.shape, jnp.sum(acc), dtype=jnp.float32)


def sparse_categorical_cross_entropy_loss(logits, labels):
    bs, fs = logits.shape[0], logits.shape[1]
    total = bs * fs * NUM_SAMPLES

    # Flat (rows, classes) layout; contiguous reshape is free.  Keep input dtype
    # (bf16 stays bf16 on the wire); cast to f32 happens inside the kernel.
    logits2 = logits.reshape(total, NUM_CLASSES)

    # Labels: lane-dense (ceil(total/64), 64) int32.  Padding only touches this
    # tiny array (never the logits).
    labels_flat = labels.reshape(total).astype(jnp.int32)
    lab_pad = (-total) % STRIP_ROWS
    if lab_pad:
        labels_flat = jnp.pad(labels_flat, (0, lab_pad))
    labels_mat = labels_flat.reshape(-1, STRIP_ROWS)

    itemsize = jnp.dtype(logits.dtype).itemsize
    max_tile = MAX_TILE_ROWS_16B if itemsize <= 2 else MAX_TILE_ROWS_F32
    if total <= 1024:
        # single tile covering everything (label block == full label array)
        tile_rows = _round_up(total, STRIP_ROWS)
    else:
        # aim for >= ~8 tiles (keeps both v7x TensorCores fed and the pipeline
        # deep); tile a multiple of 1024 so the label block keeps an (8k, 64)
        # shape that satisfies the (8, 128) block constraint.
        tile_rows = _round_up(pl.cdiv(total, 8), 1024)
        tile_rows = max(1024, min(max_tile, tile_rows))
    n_tiles = pl.cdiv(total, tile_rows)
    label_block_rows = tile_rows // STRIP_ROWS

    kernel = functools.partial(_ce_tile_kernel,
                               total_rows=total,
                               strip_rows=STRIP_ROWS)

    partial_sums = pl.pallas_call(
        kernel,
        out_shape=jax.ShapeDtypeStruct((n_tiles, 128), jnp.float32),
        grid=(n_tiles,),
        in_specs=[
            pl.BlockSpec((tile_rows, NUM_CLASSES), lambda i: (i, 0)),
            pl.BlockSpec((label_block_rows, STRIP_ROWS), lambda i: (i, 0)),
        ],
        out_specs=pl.BlockSpec((1, 128), lambda i: (i, 0)),
        compiler_params=pltpu.CompilerParams(
            dimension_semantics=("parallel",)),
    )(logits2, labels_mat)

    # CrossEntropyLoss(reduction='mean') averages over the 11 samples per batch
    # entry; summed over entries that is one global /11 applied once here.
    return jnp.sum(partial_sums[:, 0]) / jnp.float32(NUM_SAMPLES)


def _reference_loss(logits, labels):
    n = logits.shape[0] * logits.shape[1]
    x = logits.reshape(n, NUM_SAMPLES, NUM_CLASSES).astype(jnp.float32)
    y = labels.reshape(n, NUM_SAMPLES).astype(jnp.int32)
    lse = jax.scipy.special.logsumexp(x, axis=-1)                  # (n, 11)
    picked = jnp.take_along_axis(x, y[..., None], axis=-1)[..., 0]
    per_sample = lse - picked                                      # (n, 11)
    return jnp.sum(jnp.mean(per_sample, axis=-1))


if __name__ == "__main__":
    key = jax.random.PRNGKey(0)
    k1, k2, k3, k4 = jax.random.split(key, 4)

    # Case 1: small shape from the module spec (bs=2, fs=4) -> 88 rows, one tile.
    bs, fs = 2, 4
    logits = jax.random.normal(k1, (bs, fs, NUM_SAMPLES, NUM_CLASSES),
                               dtype=jnp.float32)
    labels = jax.random.randint(k2, (bs, fs, NUM_SAMPLES), 0, NUM_CLASSES,
                                dtype=jnp.int32)
    loss = jax.block_until_ready(
        sparse_categorical_cross_entropy_loss(logits, labels))
    ref = _reference_loss(logits, labels)
    assert jnp.allclose(loss, ref, rtol=1e-5, atol=1e-5), (loss, ref)

    # Case 2: 1408 rows -> multi-tile path with a ragged, masked last block.
    bs2, fs2 = 8, 16
    logits_b = jax.random.normal(k3, (bs2, fs2, NUM_SAMPLES, NUM_CLASSES),
                                 dtype=jnp.float32)
    labels_b = jax.random.randint(k4, (bs2, fs2, NUM_SAMPLES), 0, NUM_CLASSES,
                                  dtype=jnp.int32)
    loss_b = jax.block_until_ready(
        sparse_categorical_cross_entropy_loss(logits_b, labels_b))
    ref_b = _reference_loss(logits_b, labels_b)
    assert jnp.allclose(loss_b, ref_b, rtol=1e-5, atol=1e-4), (loss_b, ref_b)

    print("KERNEL_OK")
</pallas_src>

<mosaic_0001>
module attributes {stable_mosaic.version = 11 : i64} {
  func.func @_ce_tile_kernel(%arg0: i32, %arg1: memref<128x256xf32, #tpu.memory_space<vmem>>, %arg2: memref<2x64xi32, #tpu.memory_space<vmem>>, %arg3: memref<1x128xf32, #tpu.memory_space<vmem>>) attributes {dimension_semantics = [#tpu.dimension_semantics<parallel>], iteration_bounds = array<i64: 1>, scalar_prefetch = 0 : i64, scratch_operands = 0 : i64, tpu.core_type = #tpu.core_type<tc>, window_params = [{transform_indices = @transform_0, window_bounds = array<i64: 128, 256>}, {transform_indices = @transform_1, window_bounds = array<i64: 2, 64>}, {transform_indices = @transform_2, window_bounds = array<i64: 1, 128>}]} {
    %c128_i32 = arith.constant 128 : i32
    %0 = arith.muli %arg0, %c128_i32 : i32
    %cst = arith.constant 0.000000e+00 : f32
    %1 = vector.broadcast %cst : f32 to vector<64x1xf32>
    %c0_i32 = arith.constant 0 : i32
    %c64_i32 = arith.constant 64 : i32
    %2 = arith.muli %c0_i32, %c64_i32 : i32
    %3 = tpu.assume_multiple %2, 64 : i32
    %4 = arith.index_cast %3 : i32 to index
    %c0 = arith.constant 0 : index
    %5 = vector.load %arg1[%4, %c0] : memref<128x256xf32, #tpu.memory_space<vmem>>, vector<64x256xf32>
    %6 = arith.index_cast %c0_i32 : i32 to index
    %c0_0 = arith.constant 0 : index
    %7 = vector.load %arg2[%6, %c0_0] : memref<2x64xi32, #tpu.memory_space<vmem>>, vector<1x64xi32>
    %8 = arith.sitofp %7 : vector<1x64xi32> to vector<1x64xf32>
    %9 = vector.shape_cast %8 : vector<1x64xf32> to vector<1x64xf32>
    %10 = vector.broadcast %9 : vector<1x64xf32> to vector<64x64xf32>
    %11 = tpu.iota {dimensions = array<i32: 0>} : vector<64x64xi32>
    %12 = tpu.iota {dimensions = array<i32: 1>} : vector<64x64xi32>
    %13 = arith.cmpi eq, %11, %12 : vector<64x64xi32>
    %cst_1 = arith.constant 0.000000e+00 : f32
    %14 = vector.broadcast %cst_1 : f32 to vector<64x64xf32>
    %15 = arith.select %13, %10, %14 : vector<64x64xi1>, vector<64x64xf32>
    %cst_2 = arith.constant dense<0.000000e+00> : vector<64xf32>
    %16 = vector.multi_reduction <add>, %15, %cst_2 [1] : vector<64x64xf32> to vector<64xf32>
    %17 = vector.shape_cast %16 : vector<64xf32> to vector<64x1xf32>
    %18 = arith.fptosi %17 : vector<64x1xf32> to vector<64x1xi32>
    %19 = tpu.iota {dimensions = array<i32: 1>} : vector<64x256xi32>
    %20 = vector.broadcast %18 : vector<64x1xi32> to vector<64x256xi32>
    %21 = arith.cmpi eq, %19, %20 : vector<64x256xi32>
    %cst_3 = arith.constant 0.000000e+00 : f32
    %22 = vector.broadcast %cst_3 : f32 to vector<64x256xf32>
    %23 = arith.select %21, %5, %22 : vector<64x256xi1>, vector<64x256xf32>
    %cst_4 = arith.constant dense<0.000000e+00> : vector<64xf32>
    %24 = vector.multi_reduction <add>, %23, %cst_4 [1] : vector<64x256xf32> to vector<64xf32>
    %25 = vector.shape_cast %24 : vector<64xf32> to vector<64x1xf32>
    %cst_5 = arith.constant dense<0xFF800000> : vector<64xf32>
    %26 = vector.multi_reduction <maximumf>, %5, %cst_5 [1] : vector<64x256xf32> to vector<64xf32>
    %27 = vector.shape_cast %26 : vector<64xf32> to vector<64x1xf32>
    %28 = vector.broadcast %27 : vector<64x1xf32> to vector<64x256xf32>
    %29 = arith.subf %5, %28 : vector<64x256xf32>
    %30 = math.exp %29 : vector<64x256xf32>
    %cst_6 = arith.constant dense<0.000000e+00> : vector<64xf32>
    %31 = vector.multi_reduction <add>, %30, %cst_6 [1] : vector<64x256xf32> to vector<64xf32>
    %32 = vector.shape_cast %31 : vector<64xf32> to vector<64x1xf32>
    %33 = math.log %32 : vector<64x1xf32>
    %34 = arith.addf %27, %33 : vector<64x1xf32>
    %35 = arith.addi %0, %3 : i32
    %36 = tpu.iota {dimensions = array<i32: 0>} : vector<64x1xi32>
    %37 = vector.broadcast %35 : i32 to vector<64x1xi32>
    %38 = arith.addi %37, %36 : vector<64x1xi32>
    %c88_i32 = arith.constant 88 : i32
    %39 = vector.broadcast %c88_i32 : i32 to vector<64x1xi32>
    %40 = arith.cmpi slt, %38, %39 : vector<64x1xi32>
    %41 = arith.subf %34, %25 : vector<64x1xf32>
    %cst_7 = arith.constant 0.000000e+00 : f32
    %42 = vector.broadcast %cst_7 : f32 to vector<64x1xf32>
    %43 = arith.select %40, %41, %42 : vector<64x1xi1>, vector<64x1xf32>
    %44 = arith.addf %1, %43 : vector<64x1xf32>
    %c1_i32 = arith.constant 1 : i32
    %c64_i32_8 = arith.constant 64 : i32
    %45 = arith.muli %c1_i32, %c64_i32_8 : i32
    %46 = tpu.assume_multiple %45, 64 : i32
    %47 = arith.index_cast %46 : i32 to index
    %c0_9 = arith.constant 0 : index
    %48 = vector.load %arg1[%47, %c0_9] : memref<128x256xf32, #tpu.memory_space<vmem>>, vector<64x256xf32>
    %49 = arith.index_cast %c1_i32 : i32 to index
    %c0_10 = arith.constant 0 : index
    %50 = vector.load %arg2[%49, %c0_10] : memref<2x64xi32, #tpu.memory_space<vmem>>, vector<1x64xi32>
    %51 = arith.sitofp %50 : vector<1x64xi32> to vector<1x64xf32>
    %52 = vector.shape_cast %51 : vector<1x64xf32> to vector<1x64xf32>
    %53 = vector.broadcast %52 : vector<1x64xf32> to vector<64x64xf32>
    %54 = tpu.iota {dimensions = array<i32: 0>} : vector<64x64xi32>
    %55 = tpu.iota {dimensions = array<i32: 1>} : vector<64x64xi32>
    %56 = arith.cmpi eq, %54, %55 : vector<64x64xi32>
    %cst_11 = arith.constant 0.000000e+00 : f32
    %57 = vector.broadcast %cst_11 : f32 to vector<64x64xf32>
    %58 = arith.select %56, %53, %57 : vector<64x64xi1>, vector<64x64xf32>
    %cst_12 = arith.constant dense<0.000000e+00> : vector<64xf32>
    %59 = vector.multi_reduction <add>, %58, %cst_12 [1] : vector<64x64xf32> to vector<64xf32>
    %60 = vector.shape_cast %59 : vector<64xf32> to vector<64x1xf32>
    %61 = arith.fptosi %60 : vector<64x1xf32> to vector<64x1xi32>
    %62 = tpu.iota {dimensions = array<i32: 1>} : vector<64x256xi32>
    %63 = vector.broadcast %61 : vector<64x1xi32> to vector<64x256xi32>
    %64 = arith.cmpi eq, %62, %63 : vector<64x256xi32>
    %cst_13 = arith.constant 0.000000e+00 : f32
    %65 = vector.broadcast %cst_13 : f32 to vector<64x256xf32>
    %66 = arith.select %64, %48, %65 : vector<64x256xi1>, vector<64x256xf32>
    %cst_14 = arith.constant dense<0.000000e+00> : vector<64xf32>
    %67 = vector.multi_reduction <add>, %66, %cst_14 [1] : vector<64x256xf32> to vector<64xf32>
    %68 = vector.shape_cast %67 : vector<64xf32> to vector<64x1xf32>
    %cst_15 = arith.constant dense<0xFF800000> : vector<64xf32>
    %69 = vector.multi_reduction <maximumf>, %48, %cst_15 [1] : vector<64x256xf32> to vector<64xf32>
    %70 = vector.shape_cast %69 : vector<64xf32> to vector<64x1xf32>
    %71 = vector.broadcast %70 : vector<64x1xf32> to vector<64x256xf32>
    %72 = arith.subf %48, %71 : vector<64x256xf32>
    %73 = math.exp %72 : vector<64x256xf32>
    %cst_16 = arith.constant dense<0.000000e+00> : vector<64xf32>
    %74 = vector.multi_reduction <add>, %73, %cst_16 [1] : vector<64x256xf32> to vector<64xf32>
    %75 = vector.shape_cast %74 : vector<64xf32> to vector<64x1xf32>
    %76 = math.log %75 : vector<64x1xf32>
    %77 = arith.addf %70, %76 : vector<64x1xf32>
    %78 = arith.addi %0, %46 : i32
    %79 = tpu.iota {dimensions = array<i32: 0>} : vector<64x1xi32>
    %80 = vector.broadcast %78 : i32 to vector<64x1xi32>
    %81 = arith.addi %80, %79 : vector<64x1xi32>
    %c88_i32_17 = arith.constant 88 : i32
    %82 = vector.broadcast %c88_i32_17 : i32 to vector<64x1xi32>
    %83 = arith.cmpi slt, %81, %82 : vector<64x1xi32>
    %84 = arith.subf %77, %68 : vector<64x1xf32>
    %cst_18 = arith.constant 0.000000e+00 : f32
    %85 = vector.broadcast %cst_18 : f32 to vector<64x1xf32>
    %86 = arith.select %83, %84, %85 : vector<64x1xi1>, vector<64x1xf32>
    %87 = arith.addf %44, %86 : vector<64x1xf32>
    %c2_i32 = arith.constant 2 : i32
    %88 = vector.shape_cast %87 : vector<64x1xf32> to vector<1x64x1xf32>
    %cst_19 = arith.constant dense<0.000000e+00> : vector<1xf32>
    %89 = vector.multi_reduction <add>, %88, %cst_19 [1, 2] : vector<1x64x1xf32> to vector<1xf32>
    %90 = vector.shape_cast %89 : vector<1xf32> to vector<1x1x1xf32>
    %91 = vector.extract %90[0, 0, 0] : f32 from vector<1x1x1xf32>
    %92 = vector.broadcast %91 : f32 to vector<1x128xf32>
    %c0_20 = arith.constant 0 : index
    %c0_21 = arith.constant 0 : index
    %93 = vector.load %arg3[%c0_20, %c0_21] : memref<1x128xf32, #tpu.memory_space<vmem>>, vector<1x128xf32>
    tpu.vector_store %arg3[%c0_20, %c0_21], %92 {strides = array<i32>} : memref<1x128xf32, #tpu.memory_space<vmem>>, vector<1x128xf32>,
    return
  }
  func.func @transform_0(%arg0: i32) -> (i32, i32) {
    %c0_i32 = arith.constant 0 : i32
    %c0_i32_0 = arith.constant 0 : i32
    return %arg0, %c0_i32 : i32, i32
  }
  func.func @transform_1(%arg0: i32) -> (i32, i32) {
    %c0_i32 = arith.constant 0 : i32
    %c0_i32_0 = arith.constant 0 : i32
    return %arg0, %c0_i32 : i32, i32
  }
  func.func @transform_2(%arg0: i32) -> (i32, i32) {
    %c0_i32 = arith.constant 0 : i32
    %c0_i32_0 = arith.constant 0 : i32
    return %arg0, %c0_i32 : i32, i32
  }
}

</mosaic_0001>

<bundles_post_ra>
// kernel: tpu_custom_call.1
= control target key start
LH: loop header
LB: loop body
LE: loop exit
PB: predicated region body
PF: predicated region fallthrough
CT: control target
= control target key end

     0   :  { %7 = vsyncpa [#allocation3], 0  ;;  %s1095_s0 = inlined_call_operand.hbm [shape: f32[88,256], index: 0, kind: input, shape index: {}]   ;;  %s1096_s1 = inlined_call_operand.vmem [shape: s32[2,64], index: 1, kind: input, shape index: {}]   ;;  %s1097_s2 = inlined_call_operand.hbm [shape: f32[1,128], index: 2, kind: output, shape index: {}]  }
   0x1   :  { %8 = vsyncpa [#allocation4], 0 }
   0x2   :  { %13 = vsyncadd [#allocation3], 1280  ;;  %s799_s9 = smov [#allocation2]   ;;  %s751_s13 = scalar_lea.hbm %s1095_s0, 2816 }
   0x3   :  { %s14_s10 = sshll.u32 %s799_s9, 4  ;;  %p752_p0 = scmp.ne.s32.totalorder %s1095_s0, %s751_s13  ;;  %s15_s10 = int_to_ptr.vmem [resolvable:$true] %s14_s10 }
   0x4   :  { %p755_p1 = scmp.lt.u32.totalorder %s751_s13, %s1095_s0 }
   0x6   :  { %p757_p2 = pnand %p755_p1, %p752_p0 }
   0x8   :  { %760 = shalt.err (!%p757_p2)
}
   0x9   :  { %s761_s18 = scalar_lea.vmem %s15_s10, 2816  ;;  %s765_s19 = scalar_lea.vmem %s15_s10, 4096 }
   0xa   :  { %p762_p3 = scmp.ne.s32.totalorder %s15_s10, %s761_s18  ;;  %p766_p4 = scmp.lt.s32.totalorder %s15_s10, %s15_s10 }
   0xb   :  { %p767_p5 = scmp.lt.s32.totalorder %s765_s19, %s761_s18 }
   0xd   :  { %p768_p6 = por %p767_p5, %p766_p4 }
   0xf   :  { %p769_p7 = pnand %p768_p6, %p762_p3 }
  0x11   :  { %772 = shalt.err (!%p769_p7)
}
  0x12   :  { %s800_s20 = smov 256   ;;  %s801_s21 = smov 16  }
  0x13   :  { %20 = dma.hbm_to_vmem [thread:$0]  %s1095_s0, 2816, %s15_s10, [#allocation3], %s800_s20, %s800_s20, %s801_s21  }
  0x14   :  { %795 = dma.done.wait [#allocation3], 4096  }
  0x15   :  { %796 = vsyncadd [#allocation3], 4294963200  ;;  %v830_v0 = vld [vmem:[#allocation2 + $0x80] sm:$0xff]  ;;  %v832_v1 = vld [vmem:[#allocation2 + $0x88] sm:$0xff]  ;;  %v48_v7 = vlaneseq  ;;  %vm79_vm1 = vcmask 523264  }
  0x16   :  { %v834_v2 = vld [vmem:[#allocation2] sm:$0xff]  ;;  %v452_v3 = vmax.f32 %v830_v0, %v832_v1  ;;  %v838_v4 = vld [vmem:[#allocation2 + $0x8] sm:$0xff]  ;;  %v840_v5 = vld [vmem:[#allocation2 + $0x90] sm:$0xff] }
  0x17   :  { %v842_v6 = vld [vmem:[#allocation2 + $0x98] sm:$0xff]  ;;  %v169_v8 = vmax.f32 %v834_v2, %v838_v4  ;;  %v846_v9 = vld [vmem:[#allocation2 + $0x10] sm:$0xff]  ;;  %v854_v13 = vld [vmem:[#allocation2 + $0xa0] sm:$0xff]  ;;  %v862_v17 = vshrl.u32 %v48_v7, 7  ;;  %v880_v27 = vand.u32 127, %v48_v7 }
  0x18   :  { %v848_v10 = vld [vmem:[#allocation2 + $0x18] sm:$0xff]  ;;  %453 = vmax.xlane.f32.xlu1 %v452_v3  ;;  %v455_v11 = vmax.f32 %v840_v5, %v842_v6  ;;  %v856_v14 = vld [vmem:[#allocation2 + $0xa8] sm:$0xff]  ;;  %v858_v15 = vld [vmem:[#allocation2 + $0x20] sm:$0xff] }
  0x19   :  { %170 = vmax.xlane.f32.xlu0 %v169_v8  ;;  %v172_v12 = vmax.f32 %v846_v9, %v848_v10  ;;  %v860_v16 = vld [vmem:[#allocation2 + $0x28] sm:$0xff]  ;;  %v46_v18 = vld [vmem:[%s1096_s1] sm:$0x1]  ;;  %v458_v19 = vmax.f32 %v854_v13, %v856_v14  ;;  %v875_v23 = vld [vmem:[#allocation2 + $0x30] sm:$0xff]  ;;  %v50_v26 = vsub.s32 0, %v862_v17  ;;  %vm63_vm0 = vcmp.eq.s32.totalorder %v862_v17, %v880_v27 }
  0x1a   :  { %v175_v20 = vmax.f32 %v858_v15, %v860_v16  ;;  %v871_v21 = vld [vmem:[#allocation2 + $0x40] sm:$0xff]  ;;  %v873_v22 = vld [vmem:[#allocation2 + $0x48] sm:$0xff]  ;;  %v877_v24 = vld [vmem:[#allocation2 + $0x38] sm:$0xff]  ;;  %v47_v25 = vcvt.s32.f32 %v46_v18  ;;  %v54_v38 = vadd.s32 8, %v862_v17  ;;  %v55_v44 = vadd.s32 16, %v862_v17 }
  0x1b   :  { %v350_v28 = vld [vmem:[%s1096_s1 + $0x1] sm:$0x1]  ;;  %v181_v29 = vmax.f32 %v871_v21, %v873_v22  ;;  %v178_v30 = vmax.f32 %v875_v23, %v877_v24  ;;  %v891_v32 = vld [vmem:[#allocation2 + $0x68] sm:$0xff]  ;;  %v893_v33 = vld [vmem:[#allocation2 + $0x50] sm:$0xff]  ;;  %v56_v49 = vadd.s32 24, %v862_v17  ;;  %v58_v54 = vadd.s32 40, %v862_v17 }
  0x1c   :  { %456 = vmax.xlane.f32.xlu1 %v455_v11  ;;  %v889_v31 = vld [vmem:[#allocation2 + $0x60] sm:$0xff]  ;;  %v895_v34 = vld [vmem:[#allocation2 + $0x58] sm:$0xff]  ;;  %v51_v35 = vrot.slane %v47_v25, %v50_v26  ;;  %v351_v36 = vcvt.s32.f32 %v350_v28  ;;  %v907_v41 = vld [vmem:[#allocation2 + $0x70] sm:$0xff]  ;;  %vm64_vm2 = vcmp.eq.s32.totalorder %v54_v38, %v880_v27  ;;  %vm65_vm3 = vcmp.eq.s32.totalorder %v55_v44, %v880_v27  ;;  %s802_s1 = smov [#allocation5]  }
  0x1d   :  { %173 = vmax.xlane.f32.xlu0 %v172_v12  ;;  %v187_v37 = vmax.f32 %v889_v31, %v891_v32  ;;  %v184_v39 = vmax.f32 %v893_v33, %v895_v34  ;;  %v909_v42 = vld [vmem:[#allocation2 + $0x78] sm:$0xff]  ;;  %vm66_vm4 = vcmp.eq.s32.totalorder %v56_v49, %v880_v27  ;;  %v57_v55 = vadd.s32 32, %v862_v17  ;;  %s647_s27 = sshll.u32 %s802_s1, 4  ;;  %s648_s27 = int_to_ptr.vmem [resolvable:$true] %s647_s27 }
  0x1e   :  { %v71_v40 = vsel %vm63_vm0, %v51_v35, 0.0  ;;  %v355_v43 = vrot.slane %v351_v36, %v50_v26  ;;  %v190_v46 = vmax.f32 %v907_v41, %v909_v42  ;;  %v72_v48 = vsel %vm64_vm2, %v51_v35, 0.0  ;;  %s773_s29 = scalar_lea.vmem %s648_s27, 16  ;;  %s777_s30 = scalar_lea.vmem %s648_s27, 32 }
  0x1f   :  { %v80_v45 = vsel %vm79_vm1, %v71_v40, 0.0  ;;  %v83_v51 = vsel %vm79_vm1, %v72_v48, 0.0  ;;  %v73_v52 = vsel %vm65_vm3, %v51_v35, 0.0  ;;  %v74_v58 = vsel %vm66_vm4, %v51_v35, 0.0  ;;  %p774_p8 = scmp.ne.s32.totalorder %s648_s27, %s773_s29  ;;  %p778_p9 = scmp.lt.s32.totalorder %s648_s27, %s648_s27 }
  0x20   :  { %459 = vmax.xlane.f32.xlu1 %v458_v19  ;;  %v356_v47 = vsel %vm63_vm0, %v355_v43, 0.0  ;;  %v357_v53 = vsel %vm64_vm2, %v355_v43, 0.0  ;;  %v86_v56 = vsel %vm79_vm1, %v73_v52, 0.0  ;;  %v358_v59 = vsel %vm65_vm3, %v355_v43, 0.0  ;;  %p779_p10 = scmp.lt.s32.totalorder %s777_s30, %s773_s29 }
  0x21   :  { %176 = vmax.xlane.f32.xlu0 %v175_v20  ;;  %v364_v50 = vsel %vm79_vm1, %v356_v47, 0.0  ;;  %v367_v57 = vsel %vm79_vm1, %v357_v53, 0.0  ;;  %vm68_vm5 = vcmp.eq.s32.totalorder %v58_v54, %v880_v27  ;;  %v60_v60 = vadd.s32 56, %v862_v17 }
  0x22   :  { %vm67_vm6 = vcmp.eq.s32.totalorder %v57_v55, %v880_v27  ;;  %v59_v61 = vadd.s32 48, %v862_v17  ;;  %v89_v62 = vsel %vm79_vm1, %v74_v58, 0.0  ;;  %v370_v63 = vsel %vm79_vm1, %v358_v59, 0.0  ;;  %p780_p11 = por %p779_p10, %p778_p9 }
  0x23   :  { %v76_v3 = vsel %vm68_vm5, %v51_v35, 0.0  ;;  %v75_v7 = vsel %vm67_vm6, %v51_v35, 0.0  ;;  %vm70_vm7 = vcmp.eq.s32.totalorder %v60_v60, %v880_v27 }
  0x24   :  { %182 = vmax.xlane.f32.xlu1 %v181_v29  ;;  %vm69_vm8 = vcmp.eq.s32.totalorder %v59_v61, %v880_v27  ;;  %v95_v8 = vsel %vm79_vm1, %v76_v3, 0.0  ;;  %v92_v11 = vsel %vm79_vm1, %v75_v7, 0.0  ;;  %v78_v12 = vsel %vm70_vm7, %v51_v35, 0.0  ;;  %p781_p12 = pnand %p780_p11, %p774_p8 }
  0x25   :  { %179 = vmax.xlane.f32.xlu0 %v178_v30  ;;  %v77_v18 = vsel %vm69_vm8, %v51_v35, 0.0  ;;  %v101_v17 = vsel %vm79_vm1, %v78_v12, 0.0  ;;  %v991_v7 = vadd.s32 128, %v880_v27 }
  0x26   :  { %v98_v19 = vsel %vm79_vm1, %v77_v18, 0.0 }
  0x28   :  { %188 = vmax.xlane.f32.xlu1 %v187_v37 }
  0x29   :  { %185 = vmax.xlane.f32.xlu0 %v184_v39 }
  0x2c   :  { %81 = vadd.xlane.f32.xlu1 %v80_v45 }
  0x2d   :  { %191 = vmax.xlane.f32.xlu0 %v190_v46 }
  0x30   :  { %365 = vadd.xlane.f32.xlu1 %v364_v50 }
  0x31   :  { %84 = vadd.xlane.f32.xlu0 %v83_v51 }
  0x34   :  { %87 = vadd.xlane.f32.xlu1 %v86_v56 }
  0x35   :  { %368 = vadd.xlane.f32.xlu0 %v367_v57 }
  0x38   :  { %90 = vadd.xlane.f32.xlu1 %v89_v62 }
  0x39   :  { %371 = vadd.xlane.f32.xlu0 %v370_v63 }
  0x3c   :  { %96 = vadd.xlane.f32.xlu1 %v95_v8 }
  0x3d   :  { %93 = vadd.xlane.f32.xlu0 %v92_v11 }
  0x40   :  { %102 = vadd.xlane.f32.xlu1 %v101_v17 }
  0x41   :  { %99 = vadd.xlane.f32.xlu0 %v98_v19 }
  0xa5   :  { %v944_v20 = vpop.xlane.xlu1 %453 }
  0xa6   :  { %v946_v25 = vpop.xlane.xlu0 %170  ;;  %v476_v29 = vsub.f32 %v830_v0, %v944_v20  ;;  %v477_v30 = vsub.f32 %v832_v1, %v944_v20 }
  0xa7   :  { %v193_v40 = vsub.f32 %v834_v2, %v946_v25  ;;  %v194_v44 = vsub.f32 %v838_v4, %v946_v25 }
  0xa8   :  { %v492_v39 = vmul.f32 1.442695, %v476_v29  ;;  %v494_v43 = vmul.f32 1.442695, %v477_v30 }
  0xa9   :  { %v948_v26 = vpop.xlane.xlu1 %456  ;;  %v209_v51 = vmul.f32 1.442695, %v193_v40  ;;  %v211_v53 = vmul.f32 1.442695, %v194_v44 }
  0xaa   :  { %v950_v28 = vpop.xlane.xlu0 %173  ;;  %v478_v46 = vsub.f32 %v840_v5, %v948_v26  ;;  %v479_v49 = vsub.f32 %v842_v6, %v948_v26  ;;  %685 = vpow2.f32 %v492_v39 }
  0xab   :  { %v195_v36 = vsub.f32 %v846_v9, %v950_v28  ;;  %v196_v38 = vsub.f32 %v848_v10, %v950_v28  ;;  %687 = vpow2.f32 %v494_v43 }
  0xac   :  { %v496_v56 = vmul.f32 1.442695, %v478_v46  ;;  %v498_v58 = vmul.f32 1.442695, %v479_v49 }
  0xad   :  { %v956_v35 = vpop.xlane.xlu1 %459  ;;  %v213_v47 = vmul.f32 1.442695, %v195_v36  ;;  %v215_v50 = vmul.f32 1.442695, %v196_v38 }
  0xae   :  { %v960_v37 = vpop.xlane.xlu0 %176  ;;  %v480_v52 = vsub.f32 %v854_v13, %v956_v35  ;;  %v481_v54 = vsub.f32 %v856_v14, %v956_v35 }
  0xaf   :  { %689 = vpow2.f32 %v213_v47  ;;  %v197_v60 = vsub.f32 %v858_v15, %v960_v37  ;;  %v198_v61 = vsub.f32 %v860_v16, %v960_v37 }
  0xb0   :  { %691 = vpow2.f32 %v215_v50  ;;  %v500_v59 = vmul.f32 1.442695, %v480_v52  ;;  %v502_v62 = vmul.f32 1.442695, %v481_v54 }
  0xb1   :  { %v968_v45 = vpop.xlane.xlu1 %182  ;;  %693 = vpow2.f32 %v209_v51  ;;  %v217_v18 = vmul.f32 1.442695, %v197_v60  ;;  %v219_v17 = vmul.f32 1.442695, %v198_v61 }
  0xb2   :  { %v972_v48 = vpop.xlane.xlu0 %179  ;;  %695 = vpow2.f32 %v211_v53  ;;  %v201_v3 = vsub.f32 %v871_v21, %v968_v45  ;;  %v202_v12 = vsub.f32 %v873_v22, %v968_v45 }
  0xb3   :  { %697 = vpow2.f32 %v496_v56  ;;  %v199_v29 = vsub.f32 %v875_v23, %v972_v48  ;;  %v200_v30 = vsub.f32 %v877_v24, %v972_v48 }
  0xb4   :  { %699 = vpow2.f32 %v498_v58  ;;  %v1003_v38 = vpop.eup %685  ;;  %v225_v39 = vmul.f32 1.442695, %v201_v3  ;;  %v227_v46 = vmul.f32 1.442695, %v202_v12 }
  0xb5   :  { %v980_v55 = vpop.xlane.xlu1 %188  ;;  %701 = vpow2.f32 %v500_v59  ;;  %v688_v44 = vpop.eup %687  ;;  %v221_v60 = vmul.f32 1.442695, %v199_v29  ;;  %v223_v61 = vmul.f32 1.442695, %v200_v30 }
  0xb6   :  { %v982_v57 = vpop.xlane.xlu0 %185  ;;  %703 = vpow2.f32 %v502_v62  ;;  %v205_v36 = vsub.f32 %v889_v31, %v980_v55  ;;  %v206_v40 = vsub.f32 %v891_v32, %v980_v55 }
  0xb7   :  { %705 = vpow2.f32 %v217_v18  ;;  %v204_v3 = vsub.f32 %v895_v34, %v982_v57 }
  0xb8   :  { %707 = vpow2.f32 %v219_v17  ;;  %v233_v56 = vmul.f32 1.442695, %v205_v36  ;;  %v235_v62 = vmul.f32 1.442695, %v206_v40 }
  0xb9   :  { %v82_v63 = vpop.xlane.xlu1 %81  ;;  %v690_v52 = vpop.eup %689  ;;  %709 = vpow2.f32 %v225_v39 }
  0xba   :  { %v657_v8 = vtrunc.f32 %v82_v63  ;;  %v993_v11 = vpop.xlane.xlu0 %191  ;;  %v692_v54 = vpop.eup %691  ;;  %711 = vpow2.f32 %v227_v46 }
  0xbb   :  { %v694_v59 = vpop.eup %693  ;;  %v244_v18 = vadd.f32 %v692_v54, %v690_v52  ;;  %713 = vpow2.f32 %v233_v56 }
  0xbc   :  { %v658_v19 = vcvt.f32.s32 %v657_v8  ;;  %v696_v63 = vpop.eup %695  ;;  %715 = vpow2.f32 %v235_v62 }
  0xbd   :  { %v366_v51 = vpop.xlane.xlu1 %365  ;;  %717 = vpow2.f32 %v221_v60 }
  0xbe   :  { %vm113_vm9 = vcmp.eq.s32.totalorder %v880_v27, %v658_v19  ;;  %vm114_vm10 = vcmp.eq.s32.totalorder %v991_v7, %v658_v19  ;;  %v85_v43 = vpop.xlane.xlu0 %84  ;;  %v673_v40 = vtrunc.f32 %v366_v51  ;;  %719 = vpow2.f32 %v223_v61 }
  0xbf   :  { %v659_v47 = vtrunc.f32 %v85_v43  ;;  %v129_v49 = vsel %vm113_vm9, %v834_v2, 0.0  ;;  %v130_v50 = vsel %vm114_vm10, %v838_v4, 0.0  ;;  %v203_v2 = vsub.f32 %v893_v33, %v982_v57  ;;  %v698_v4 = vpop.eup %697 }
  0xc0   :  { %v145_v53 = vadd.f32 %v130_v50, %v129_v49  ;;  %v700_v17 = vpop.eup %699  ;;  %v231_v43 = vmul.f32 1.442695, %v204_v3  ;;  %v208_v50 = vsub.f32 %v909_v42, %v993_v11 }
  0xc1   :  { %v660_v58 = vcvt.f32.s32 %v659_v47  ;;  %v88_v29 = vpop.xlane.xlu1 %87  ;;  %v702_v30 = vpop.eup %701  ;;  %v229_v39 = vmul.f32 1.442695, %v203_v2  ;;  %v527_v46 = vadd.f32 %v700_v17, %v698_v4 }
  0xc2   :  { %146 = vadd.xlane.f32.xlu1 %v145_v53  ;;  %v704_v36 = vpop.eup %703  ;;  %v369_v47 = vpop.xlane.xlu0 %368  ;;  %v674_v53 = vcvt.f32.s32 %v673_v40  ;;  %v661_v54 = vtrunc.f32 %v88_v29 }
  0xc3   :  { %vm115_vm11 = vcmp.eq.s32.totalorder %v880_v27, %v660_v58  ;;  %vm116_vm12 = vcmp.eq.s32.totalorder %v991_v7, %v660_v58  ;;  %v706_v49 = vpop.eup %705  ;;  %721 = vpow2.f32 %v229_v39  ;;  %v530_v58 = vadd.f32 %v704_v36, %v702_v30 }
  0xc4   :  { %v131_v8 = vsel %vm115_vm11, %v846_v9, 0.0  ;;  %v132_v12 = vsel %vm116_vm12, %v848_v10, 0.0  ;;  %v207_v9 = vsub.f32 %v907_v41, %v993_v11  ;;  %v241_v10 = vadd.f32 %v696_v63, %v694_v59  ;;  %v708_v52 = vpop.eup %707 }
  0xc5   :  { %v148_v19 = vadd.f32 %v132_v12, %v131_v8  ;;  %v91_v56 = vpop.xlane.xlu1 %90  ;;  %v710_v51 = vpop.eup %709  ;;  %723 = vpow2.f32 %v231_v43  ;;  %v675_v60 = vtrunc.f32 %v369_v47  ;;  %v524_v59 = vadd.f32 %v688_v44, %v1003_v38 }
  0xc6   :  { %245 = vadd.xlane.f32.xlu1 %v244_v18  ;;  %v712_v61 = vpop.eup %711  ;;  %v237_v62 = vmul.f32 1.442695, %v207_v9  ;;  %v239_v63 = vmul.f32 1.442695, %v208_v50  ;;  %v372_v2 = vpop.xlane.xlu0 %371  ;;  %vm396_vm13 = vcmp.eq.s32.totalorder %v880_v27, %v674_v53  ;;  %v662_v3 = vcvt.f32.s32 %v661_v54 }
  0xc7   :  { %149 = vadd.xlane.f32.xlu0 %v148_v19  ;;  %v714_v4 = vpop.eup %713  ;;  %v253_v12 = vadd.f32 %v712_v61, %v710_v51  ;;  %vm397_vm14 = vcmp.eq.s32.totalorder %v991_v7, %v674_v53  ;;  %v676_v18 = vcvt.f32.s32 %v675_v60  ;;  %v663_v17 = vtrunc.f32 %v91_v56 }
  0xc8   :  { %v716_v8 = vpop.eup %715  ;;  %725 = vpow2.f32 %v237_v62  ;;  %v247_v29 = vadd.f32 %v708_v52, %v706_v49  ;;  %v412_v38 = vsel %vm396_vm13, %v830_v0, 0.0  ;;  %vm117_vm15 = vcmp.eq.s32.totalorder %v880_v27, %v662_v3 }
  0xc9   :  { %v718_v19 = vpop.eup %717  ;;  %v97_v30 = vpop.xlane.xlu1 %96  ;;  %727 = vpow2.f32 %v239_v63  ;;  %v259_v44 = vadd.f32 %v716_v8, %v714_v4  ;;  %vm118_vm0 = vcmp.eq.s32.totalorder %v991_v7, %v662_v3  ;;  %v413_v39 = vsel %vm397_vm14, %v832_v1, 0.0 }
  0xca   :  { %528 = vadd.xlane.f32.xlu1 %v527_v46  ;;  %v720_v36 = vpop.eup %719  ;;  %vm398_vm1 = vcmp.eq.s32.totalorder %v880_v27, %v676_v18  ;;  %vm399_vm2 = vcmp.eq.s32.totalorder %v991_v7, %v676_v18  ;;  %v664_v40 = vcvt.f32.s32 %v663_v17  ;;  %v667_v43 = vtrunc.f32 %v97_v30  ;;  %v94_v46 = vpop.xlane.xlu0 %93 }
  0xcb   :  { %242 = vadd.xlane.f32.xlu0 %v241_v10  ;;  %v250_v10 = vadd.f32 %v720_v36, %v718_v19  ;;  %v677_v47 = vtrunc.f32 %v372_v2  ;;  %v428_v50 = vadd.f32 %v413_v39, %v412_v38  ;;  %v414_v52 = vsel %vm398_vm1, %v840_v5, 0.0 }
  0xcc   :  { %v415_v53 = vsel %vm399_vm2, %v842_v6, 0.0  ;;  %v133_v1 = vsel %vm117_vm15, %v858_v15, 0.0  ;;  %v134_v54 = vsel %vm118_vm0, %v860_v16, 0.0  ;;  %vm119_vm3 = vcmp.eq.s32.totalorder %v880_v27, %v664_v40 }
  0xcd   :  { %v722_v9 = vpop.eup %721  ;;  %v103_v49 = vpop.xlane.xlu1 %102  ;;  %vm120_vm4 = vcmp.eq.s32.totalorder %v991_v7, %v664_v40  ;;  %v668_v56 = vcvt.f32.s32 %v667_v43  ;;  %v678_v60 = vcvt.f32.s32 %v677_v47  ;;  %v665_v61 = vtrunc.f32 %v94_v46 }
  0xce   :  { %531 = vadd.xlane.f32.xlu1 %v530_v58  ;;  %v671_v51 = vtrunc.f32 %v103_v49  ;;  %v151_v5 = vadd.f32 %v134_v54, %v133_v1  ;;  %v100_v6 = vpop.xlane.xlu0 %99  ;;  %v135_v15 = vsel %vm119_vm3, %v875_v23, 0.0  ;;  %v136_v63 = vsel %vm120_vm4, %v877_v24, 0.0 }
  0xcf   :  { %525 = vadd.xlane.f32.xlu0 %v524_v59  ;;  %v724_v0 = vpop.eup %723  ;;  %v431_v59 = vadd.f32 %v415_v53, %v414_v52  ;;  %vm123_vm5 = vcmp.eq.s32.totalorder %v880_v27, %v668_v56  ;;  %vm124_vm6 = vcmp.eq.s32.totalorder %v991_v7, %v668_v56  ;;  %vm400_vm7 = vcmp.eq.s32.totalorder %v880_v27, %v678_v60 }
  0xd0   :  { %v256_v58 = vadd.f32 %v724_v0, %v722_v9  ;;  %v672_v2 = vcvt.f32.s32 %v671_v51  ;;  %vm401_vm8 = vcmp.eq.s32.totalorder %v991_v7, %v678_v60  ;;  %v666_v4 = vcvt.f32.s32 %v665_v61 }
  0xd1   :  { %v669_v3 = vtrunc.f32 %v100_v6  ;;  %v154_v8 = vadd.f32 %v136_v63, %v135_v15  ;;  %v140_v23 = vsel %vm124_vm6, %v895_v34, 0.0  ;;  %v416_v24 = vsel %vm400_vm7, %v854_v13, 0.0 }
  0xd2   :  { %254 = vadd.xlane.f32.xlu1 %v253_v12  ;;  %v726_v62 = vpop.eup %725  ;;  %v139_v12 = vsel %vm123_vm5, %v893_v33, 0.0  ;;  %v417_v18 = vsel %vm401_vm8, %v856_v14, 0.0  ;;  %vm127_vm9 = vcmp.eq.s32.totalorder %v880_v27, %v672_v2  ;;  %vm128_vm10 = vcmp.eq.s32.totalorder %v991_v7, %v672_v2 }
  0xd3   :  { %248 = vadd.xlane.f32.xlu0 %v247_v29  ;;  %v728_v16 = vpop.eup %727  ;;  %vm121_vm11 = vcmp.eq.s32.totalorder %v880_v27, %v666_v4  ;;  %vm122_vm12 = vcmp.eq.s32.totalorder %v991_v7, %v666_v4  ;;  %v670_v19 = vcvt.f32.s32 %v669_v3  ;;  %v160_v29 = vadd.f32 %v140_v23, %v139_v12 }
  0xd4   :  { %v262_v17 = vadd.f32 %v728_v16, %v726_v62  ;;  %v434_v33 = vadd.f32 %v417_v18, %v416_v24  ;;  %v143_v34 = vsel %vm127_vm9, %v907_v41, 0.0  ;;  %v144_v13 = vsel %vm128_vm10, %v909_v42, 0.0 }
  0xd5   :  { %v137_v14 = vsel %vm121_vm11, %v871_v21, 0.0  ;;  %v138_v30 = vsel %vm122_vm12, %v873_v22, 0.0  ;;  %vm125_vm13 = vcmp.eq.s32.totalorder %v880_v27, %v670_v19  ;;  %vm126_vm14 = vcmp.eq.s32.totalorder %v991_v7, %v670_v19 }
  0xd6   :  { %260 = vadd.xlane.f32.xlu1 %v259_v44  ;;  %v166_v36 = vadd.f32 %v144_v13, %v143_v34  ;;  %v157_v38 = vadd.f32 %v138_v30, %v137_v14  ;;  %v141_v44 = vsel %vm125_vm13, %v889_v31, 0.0  ;;  %v142_v39 = vsel %vm126_vm14, %v891_v32, 0.0 }
  0xd7   :  { %251 = vadd.xlane.f32.xlu0 %v250_v10  ;;  %v163_v41 = vadd.f32 %v142_v39, %v141_v44  ;;  %vm614_vm15 = vcmask 7168  }
  0xda   :  { %429 = vadd.xlane.f32.xlu1 %v428_v50 }
  0xdb   :  { %257 = vadd.xlane.f32.xlu0 %v256_v58 }
  0xde   :  { %152 = vadd.xlane.f32.xlu1 %v151_v5 }
  0xdf   :  { %432 = vadd.xlane.f32.xlu0 %v431_v59 }
  0xe2   :  { %155 = vadd.xlane.f32.xlu1 %v154_v8 }
  0xe3   :  { %263 = vadd.xlane.f32.xlu0 %v262_v17 }
  0xe6   :  { %161 = vadd.xlane.f32.xlu1 %v160_v29 }
  0xe7   :  { %435 = vadd.xlane.f32.xlu0 %v434_v33 }
  0xea   :  { %167 = vadd.xlane.f32.xlu1 %v166_v36 }
  0xeb   :  { %158 = vadd.xlane.f32.xlu0 %v157_v38 }
  0xef   :  { %164 = vadd.xlane.f32.xlu0 %v163_v41 }
 0x14f   :  { %v147_v42 = vpop.xlane.xlu1 %146 }
 0x153   :  { %v246_v21 = vpop.xlane.xlu1 %245 }
 0x154   :  { %v150_v40 = vpop.xlane.xlu0 %149  ;;  %729 = vlog2.f32 %v246_v21 }
 0x157   :  { %v529_v22 = vpop.xlane.xlu1 %528 }
 0x158   :  { %v243_v27 = vpop.xlane.xlu0 %242  ;;  %731 = vlog2.f32 %v529_v22 }
 0x159   :  { %733 = vlog2.f32 %v243_v27 }
 0x15b   :  { %v532_v7 = vpop.xlane.xlu1 %531 }
 0x15c   :  { %v526_v43 = vpop.xlane.xlu0 %525 }
 0x15d   :  { %735 = vlog2.f32 %v526_v43 }
 0x15e   :  { %v730_v31 = vpop.eup %729 }
 0x15f   :  { %v255_v46 = vpop.xlane.xlu1 %254  ;;  %v268_v50 = vmul.f32 0.6931472, %v730_v31 }
 0x160   :  { %v249_v9 = vpop.xlane.xlu0 %248 }
 0x161   :  { %737 = vlog2.f32 %v249_v9  ;;  %v282_v60 = vadd.f32 %v268_v50, %v950_v28 }
 0x162   :  { %739 = vlog2.f32 %v532_v7  ;;  %v732_v32 = vpop.eup %731 }
 0x163   :  { %v261_v10 = vpop.xlane.xlu1 %260  ;;  %v734_v47 = vpop.eup %733  ;;  %741 = vlog2.f32 %v255_v46  ;;  %v551_v53 = vmul.f32 0.6931472, %v732_v32  ;;  %v308_v12 = vsub.f32 %v282_v60, %v150_v40 }
 0x164   :  { %v252_v49 = vpop.xlane.xlu0 %251  ;;  %v266_v52 = vmul.f32 0.6931472, %v734_v47 }
 0x165   :  { %743 = vlog2.f32 %v252_v49  ;;  %v565_v5 = vadd.f32 %v551_v53, %v948_v26 }
 0x166   :  { %v281_v61 = vadd.f32 %v266_v52, %v946_v25 }
 0x167   :  { %v736_v0 = vpop.eup %735  ;;  %v430_v1 = vpop.xlane.xlu1 %429 }
 0x168   :  { %v549_v54 = vmul.f32 0.6931472, %v736_v0  ;;  %v258_v56 = vpop.xlane.xlu0 %257  ;;  %v307_v8 = vsub.f32 %v281_v61, %v147_v42 }
 0x169   :  { %745 = vlog2.f32 %v258_v56 }
 0x16a   :  { %747 = vlog2.f32 %v261_v10  ;;  %v564_v51 = vadd.f32 %v549_v54, %v944_v20 }
 0x16b   :  { %v738_v58 = vpop.eup %737  ;;  %v153_v59 = vpop.xlane.xlu1 %152 }
 0x16c   :  { %v740_v6 = vpop.eup %739  ;;  %v433_v62 = vpop.xlane.xlu0 %432  ;;  %v270_v15 = vmul.f32 0.6931472, %v738_v58  ;;  %v590_v63 = vsub.f32 %v564_v51, %v430_v1 }
 0x16d   :  { %v591_v16 = vsub.f32 %v565_v5, %v433_v62  ;;  %v742_v2 = vpop.eup %741  ;;  %v553_v3 = vmul.f32 0.6931472, %v740_v6 }
 0x16e   :  { %v606_v24 = vadd.f32 %v590_v63, %v307_v8  ;;  %v283_v28 = vadd.f32 %v270_v15, %v960_v37  ;;  %v274_v25 = vmul.f32 0.6931472, %v742_v2 }
 0x16f   :  { %v744_v4 = vpop.eup %743  ;;  %v607_v18 = vadd.f32 %v591_v16, %v308_v12  ;;  %v156_v26 = vpop.xlane.xlu1 %155  ;;  %v566_v29 = vadd.f32 %v553_v3, %v956_v35 }
 0x170   :  { %v272_v23 = vmul.f32 0.6931472, %v744_v4  ;;  %v264_v20 = vpop.xlane.xlu0 %263  ;;  %v615_v14 = vsel %vm614_vm15, %v606_v24, 0.0  ;;  %v309_v36 = vsub.f32 %v283_v28, %v153_v59  ;;  %v285_v37 = vadd.f32 %v274_v25, %v968_v45 }
 0x171   :  { %749 = vlog2.f32 %v264_v20  ;;  %v616_v30 = vsel %vm614_vm15, %v607_v18, 0.0 }
 0x172   :  { %v284_v19 = vadd.f32 %v272_v23, %v972_v48  ;;  %v617_v21 = vadd.f32 %v616_v30, %v615_v14 }
 0x173   :  { %v746_v17 = vpop.eup %745  ;;  %v162_v48 = vpop.xlane.xlu1 %161 }
 0x174   :  { %v748_v33 = vpop.eup %747  ;;  %v276_v34 = vmul.f32 0.6931472, %v746_v17  ;;  %v436_v13 = vpop.xlane.xlu0 %435  ;;  %v310_v39 = vsub.f32 %v284_v19, %v156_v26 }
 0x175   :  { %v592_v38 = vsub.f32 %v566_v29, %v436_v13  ;;  %v278_v44 = vmul.f32 0.6931472, %v748_v33 }
 0x176   :  { %v286_v42 = vadd.f32 %v276_v34, %v982_v57  ;;  %v620_v43 = vsel %vm614_vm15, %v310_v39, 0.0 }
 0x177   :  { %v608_v41 = vadd.f32 %v592_v38, %v309_v36  ;;  %v287_v9 = vadd.f32 %v278_v44, %v980_v55  ;;  %v168_v57 = vpop.xlane.xlu1 %167 }
 0x178   :  { %v159_v40 = vpop.xlane.xlu0 %158  ;;  %v312_v46 = vsub.f32 %v286_v42, %v162_v48 }
 0x179   :  { %v618_v35 = vsel %vm614_vm15, %v608_v41, 0.0  ;;  %v311_v22 = vsub.f32 %v285_v37, %v159_v40 }
 0x17a   :  { %v619_v27 = vadd.f32 %v618_v35, %v617_v21  ;;  %v624_v50 = vsel %vm614_vm15, %v312_v46, 0.0 }
 0x17b   :  { %v750_v7 = vpop.eup %749  ;;  %v622_v10 = vsel %vm614_vm15, %v311_v22, 0.0 }
 0x17c   :  { %v280_v31 = vmul.f32 0.6931472, %v750_v7  ;;  %v621_v45 = vadd.f32 %v620_v43, %v619_v27  ;;  %v165_v32 = vpop.xlane.xlu0 %164 }
 0x17d   :  { %v313_v47 = vsub.f32 %v287_v9, %v165_v32 }
 0x17e   :  { %v623_v49 = vadd.f32 %v622_v10, %v621_v45  ;;  %v288_v0 = vadd.f32 %v280_v31, %v993_v11 }
 0x17f   :  { %v626_v1 = vsel %vm614_vm15, %v313_v47, 0.0 }
 0x180   :  { %v314_v52 = vsub.f32 %v288_v0, %v168_v57  ;;  %v625_v53 = vadd.f32 %v624_v50, %v623_v49 }
 0x182   :  { %v627_v54 = vadd.f32 %v626_v1, %v625_v53  ;;  %v628_v56 = vsel %vm614_vm15, %v314_v52, 0.0 }
 0x184   :  { %v629_v55 = vadd.f32 %v628_v56, %v627_v54 }
 0x186   :  { %630 = vadd.xlane.f32.xlu0 %v629_v55 }
 0x213   :  { %v631_v51 = vpop.xlane.xlu0 %630 }
 0x214   :  { %v632_v58 = vrot.slane %v631_v51, 4 }
 0x216   :  { %v633_v60 = vadd.f32 %v632_v58, %v631_v51 }
 0x218   :  { %v634_v61 = vrot.slane %v633_v60, 2 }
 0x21a   :  { %v635_v5 = vadd.f32 %v634_v61, %v633_v60 }
 0x21c   :  { %v636_v6 = vrot.slane %v635_v5, 1 }
 0x21e   :  { %v637_v62 = vadd.f32 %v636_v6, %v635_v5 }
 0x220   :  { %679 = vpush %v637_v62 }
 0x251   :  { %s680_s28 = spop %679 }
 0x252   :  { %v639_v11 = vstv %s680_s28 }
 0x253   :  { %640 = vst [vmem:[#allocation5] sm:$0x1] %v639_v11 }
 0x254   :  { %784 = shalt.err (!%p781_p12)
}
 0x255   :  { %s785_s5 = scalar_lea.hbm %s1097_s2, 16 }
 0x256   :  { %p786_p13 = scmp.ne.s32.totalorder %s1097_s2, %s785_s5  ;;  %p789_p0 = scmp.lt.u32.totalorder %s785_s5, %s1097_s2 }
 0x258   :  { %p791_p1 = pnand %p789_p0, %p786_p13 }
 0x25a   :  { %794 = shalt.err (!%p791_p1)
}
 0x25b   :  { %650 = dma.vmem_to_hbm [thread:$0]  %s648_s27, 16, %s1097_s2, [#allocation4]  }
 0x25c   :  { %797 = dma.done.wait [#allocation4], 16  }
 0x25d   :  { %798 = vsyncadd [#allocation4], 4294967280 }
 0x25e   :  { %654 = vsyncpa [#allocation3], 1 }
 0x25f   :  { %655 = vsyncpa [#allocation4], 1 }

</bundles_post_ra>
